<compile_context>
chip_gen: v7x
topology: tpu7x:2x2x1
jax: 0.10.0
libtpu: 0.0.40
codegen_flags: <defaults>
</compile_context>

<pallas_src>
import math
from functools import partial

import jax
import jax.numpy as jnp
from jax.experimental import pallas as pl
from jax.experimental.pallas import tpu as pltpu


# ---------------------------------------------------------------------------
# Buffer setup (same math as the torch __init__)
# ---------------------------------------------------------------------------
def build_pe(d_model: int, max_len: int = 5000, dtype=jnp.float32):
    position = jnp.arange(max_len, dtype=jnp.float32)[:, None]               # (max_len, 1)
    div_term = jnp.exp(
        jnp.arange(0, d_model, 2, dtype=jnp.float32) * (-math.log(10000.0) / d_model)
    )                                                                         # (d_model//2,)
    angles = position * div_term                                              # (max_len, d_model//2)
    pe = jnp.zeros((max_len, d_model), dtype=jnp.float32)
    pe = pe.at[:, 0::2].set(jnp.sin(angles))
    pe = pe.at[:, 1::2].set(jnp.cos(angles))
    return pe.astype(dtype)                                                   # (max_len, d_model)


# ---------------------------------------------------------------------------
# Kernel: x-tile + (batch-replicated) PE-tile, optional inverted dropout
# ---------------------------------------------------------------------------
def _pe_add_dropout_kernel(*refs, reps: int, p: float, use_dropout: bool):
    if use_dropout:
        x_ref, pe_ref, u_ref, o_ref = refs
    else:
        x_ref, pe_ref, o_ref = refs

    pe = pe_ref[...]                           # (ts, D), already x.dtype (cast hoisted)
    if reps > 1:
        # Replicate the tiny PE tile across the batch rows of this block, in VMEM only
        # (never in HBM): (ts, D) -> (ts, reps*D) matching the flattened x layout.
        pe = jnp.tile(pe, (1, reps))

    y = x_ref[...] + pe                        # (ts, tb*D)

    if use_dropout:
        keep = u_ref[...] >= jnp.float32(p)    # keep with prob (1 - p)
        scale = jnp.asarray(1.0 / (1.0 - p), dtype=y.dtype)
        y = jnp.where(keep, y * scale, jnp.zeros_like(y))

    o_ref[...] = y


# ---------------------------------------------------------------------------
# VMEM-budgeted tile selection (works for v5e / v6e / v7x scoped-VMEM limits)
# ---------------------------------------------------------------------------
def _choose_tiles(S, Bflat, D, itemsize, use_dropout):
    # Bytes streamed per x element in one block set: x in + out (+ f32 dropout uniforms).
    per_elem = 2 * itemsize + (4 if use_dropout else 0)
    # One in-flight block set; BlockSpec double-buffers, so peak VMEM ~= 2x this (+PE),
    # comfortably below v5e's 16 MiB scoped limit and v7x's smaller VMEM, while blocks
    # stay large enough (>=~1 MiB of x) to sit near the HBM roofline.
    budget_bytes = 2 * 1024 * 1024
    target_elems = max(8 * 128, budget_bytes // per_elem)

    W = Bflat * D
    if W * min(S, 8) <= target_elems:
        # Full-width blocks, tile the sequence axis only.
        tb = Bflat
        ts = target_elems // W
        ts = S if ts >= S else min(S, max(8, (ts // 8) * 8))     # sublane-aligned
    else:
        # A full row is already big: 8-row blocks, tile the (batch*D) width in whole
        # batch units, keeping tb*D a multiple of 128 so stores stay unmasked.
        ts = S if S < 8 else 8
        step = 128 // math.gcd(D, 128)
        tb = max(step, ((target_elems // (ts * D)) // step) * step)
        tb = min(tb, Bflat)
    return ts, tb


# ---------------------------------------------------------------------------
# Forward wrapper (equivalent of PositionalEncoding.forward)
# ---------------------------------------------------------------------------
def positional_encoding_forward(x, pe, *, p: float = 0.1, training: bool = False,
                                rng_key=None):
    """x: (S, B, D) or (S, A, B, D); pe: (max_len, D) from build_pe."""
    orig_shape = x.shape
    if x.ndim == 4:
        S, A, B, D = x.shape
        Bflat = A * B
    elif x.ndim == 3:
        S, B, D = x.shape
        Bflat = B
    else:
        raise ValueError(f"expected 3D or 4D input, got {x.shape}")

    use_dropout = bool(training) and p > 0.0
    if use_dropout and p >= 1.0:
        # torch nn.Dropout(p=1) zeroes everything in training mode.
        return jnp.zeros_like(x)

    W = Bflat * D
    x2 = x.reshape(S, W)                                   # lane-dense 2-D view
    pe_slice = pe[:S].astype(x.dtype)                      # hoisted slice + dtype cast

    ts, tb = _choose_tiles(S, Bflat, D, x.dtype.itemsize, use_dropout)
    tw = tb * D
    grid = (pl.cdiv(S, ts), pl.cdiv(Bflat, tb))

    in_specs = [
        pl.BlockSpec((ts, tw), lambda i, j: (i, j)),        # x tile
        pl.BlockSpec((ts, D), lambda i, j: (i, 0)),         # PE tile (batch-independent)
    ]
    inputs = [x2, pe_slice]

    if use_dropout:
        if rng_key is None:
            rng_key = jax.random.PRNGKey(0)
        # Mask generated once over the full array -> independent of tiling choice.
        u = jax.random.uniform(rng_key, (S, W), dtype=jnp.float32)
        in_specs.append(pl.BlockSpec((ts, tw), lambda i, j: (i, j)))
        inputs.append(u)

    kernel = partial(_pe_add_dropout_kernel, reps=tb, p=float(p),
                     use_dropout=use_dropout)

    out2 = pl.pallas_call(
        kernel,
        out_shape=jax.ShapeDtypeStruct((S, W), x.dtype),
        grid=grid,
        in_specs=in_specs,
        out_specs=pl.BlockSpec((ts, tw), lambda i, j: (i, j)),
        compiler_params=pltpu.CompilerParams(
            dimension_semantics=("parallel", "parallel"),   # independent tiles; v7x 2-TC
        ),
    )(*inputs)

    return out2.reshape(orig_shape)


# ---------------------------------------------------------------------------
if __name__ == "__main__":
    S, B, D = 8, 2, 32
    key = jax.random.PRNGKey(0)
    kx, k4, kdrop = jax.random.split(key, 3)

    x = jax.random.normal(kx, (S, B, D), dtype=jnp.float32)
    pe = build_pe(d_model=D, max_len=5000)

    # eval-mode forward (dropout is identity) -> exact reference check
    out_eval = jax.block_until_ready(
        positional_encoding_forward(x, pe, p=0.1, training=False))
    ref = x + pe[:S][:, None, :]
    assert out_eval.shape == x.shape and out_eval.dtype == x.dtype
    assert jnp.allclose(out_eval, ref, atol=1e-6, rtol=1e-6), "eval mismatch vs reference"

    # training-mode forward: every element is either 0 (dropped) or ref/(1-p) (kept)
    p = 0.1
    out_tr = jax.block_until_ready(
        positional_encoding_forward(x, pe, p=p, training=True, rng_key=kdrop))
    assert out_tr.shape == x.shape and out_tr.dtype == x.dtype
    scaled = ref / (1.0 - p)
    ok = (out_tr == 0) | (jnp.abs(out_tr - scaled) <= 1e-5 * jnp.abs(scaled) + 1e-6)
    assert bool(jnp.all(ok)), "training output not consistent with inverted dropout"

    # p >= 1 edge case: all zeros
    out_p1 = jax.block_until_ready(
        positional_encoding_forward(x, pe, p=1.0, training=True, rng_key=kdrop))
    assert bool(jnp.all(out_p1 == 0))

    # 4-D path (matches the torch `if len(x.shape) == 4` branch)
    x4 = jax.random.normal(k4, (S, 3, B, D), dtype=jnp.float32)
    out4 = jax.block_until_ready(positional_encoding_forward(x4, pe, training=False))
    ref4 = x4 + pe[:S][:, None, None, :]
    assert jnp.allclose(out4, ref4, atol=1e-6, rtol=1e-6), "4D mismatch vs reference"

    print("KERNEL_OK")
</pallas_src>

<mosaic_0001>
module attributes {stable_mosaic.version = 11 : i64} {
  func.func @_pe_add_dropout_kernel(%arg0: i32, %arg1: i32, %arg2: memref<8x64xf32, #tpu.memory_space<vmem>>, %arg3: memref<8x32xf32, #tpu.memory_space<vmem>>, %arg4: memref<8x64xf32, #tpu.memory_space<vmem>>) attributes {dimension_semantics = [#tpu.dimension_semantics<parallel>, #tpu.dimension_semantics<parallel>], iteration_bounds = array<i64: 1, 1>, scalar_prefetch = 0 : i64, scratch_operands = 0 : i64, tpu.core_type = #tpu.core_type<tc>, window_params = [{transform_indices = @transform_0, window_bounds = array<i64: 8, 64>}, {transform_indices = @transform_1, window_bounds = array<i64: 8, 32>}, {transform_indices = @transform_2, window_bounds = array<i64: 8, 64>}]} {
    %c0 = arith.constant 0 : index
    %c0_0 = arith.constant 0 : index
    %0 = vector.load %arg3[%c0, %c0_0] : memref<8x32xf32, #tpu.memory_space<vmem>>, vector<8x32xf32>
    %1 = tpu.concatenate %0, %0 in 1 : vector<8x32xf32>, vector<8x32xf32> -> vector<8x64xf32>
    %c0_1 = arith.constant 0 : index
    %c0_2 = arith.constant 0 : index
    %2 = vector.load %arg2[%c0_1, %c0_2] : memref<8x64xf32, #tpu.memory_space<vmem>>, vector<8x64xf32>
    %3 = arith.addf %2, %1 : vector<8x64xf32>
    %c0_3 = arith.constant 0 : index
    %c0_4 = arith.constant 0 : index
    %4 = vector.load %arg4[%c0_3, %c0_4] : memref<8x64xf32, #tpu.memory_space<vmem>>, vector<8x64xf32>
    tpu.vector_store %arg4[%c0_3, %c0_4], %3 {strides = array<i32>} : memref<8x64xf32, #tpu.memory_space<vmem>>, vector<8x64xf32>,
    return
  }
  func.func @transform_0(%arg0: i32, %arg1: i32) -> (i32, i32) {
    %c0_i32 = arith.constant 0 : i32
    return %arg0, %arg1 : i32, i32
  }
  func.func @transform_1(%arg0: i32, %arg1: i32) -> (i32, i32) {
    %c0_i32 = arith.constant 0 : i32
    %c0_i32_0 = arith.constant 0 : i32
    return %arg0, %c0_i32 : i32, i32
  }
  func.func @transform_2(%arg0: i32, %arg1: i32) -> (i32, i32) {
    %c0_i32 = arith.constant 0 : i32
    return %arg0, %arg1 : i32, i32
  }
}

</mosaic_0001>

<bundles_post_ra>
// kernel: tpu_custom_call.1
= control target key start
LH: loop header
LB: loop body
LE: loop exit
PB: predicated region body
PF: predicated region fallthrough
CT: control target
= control target key end

     0   :  { %7 = vsyncpa [#allocation3], 0  ;;  %s194_s0 = inlined_call_operand.hbm [shape: f32[8,64], index: 0, kind: input, shape index: {}]   ;;  %s195_s1 = inlined_call_operand.hbm [shape: f32[8,32], index: 1, kind: input, shape index: {}]   ;;  %s196_s2 = inlined_call_operand.hbm [shape: f32[8,64], index: 2, kind: output, shape index: {}]  }
   0x1   :  { %8 = vsyncpa [#allocation6], 0 }
   0x2   :  { %9 = vsyncpa [#allocation4], 0  ;;  %s139_s9 = smov [#allocation2]   ;;  %s140_s11 = smov [#allocation5]  }
   0x3   :  { %s16_s10 = sshll.u32 %s139_s9, 4  ;;  %s26_s12 = sshll.u32 %s140_s11, 4  ;;  %s17_s10 = int_to_ptr.vmem [resolvable:$true] %s16_s10  ;;  %s27_s12 = int_to_ptr.vmem [resolvable:$true] %s26_s12 }
   0x4   :  { %s67_s15 = scalar_lea.hbm %s194_s0, 128 }
   0x5   :  { %p68_p0 = scmp.ne.s32.totalorder %s194_s0, %s67_s15  ;;  %p71_p1 = scmp.lt.u32.totalorder %s67_s15, %s194_s0 }
   0x7   :  { %p73_p2 = pnand %p71_p1, %p68_p0 }
   0x9   :  { %76 = shalt.err (!%p73_p2)
}
   0xa   :  { %s77_s20 = scalar_lea.vmem %s17_s10, 128  ;;  %p82_p4 = scmp.lt.s32.totalorder %s17_s10, %s17_s10 }
   0xb   :  { %p78_p3 = scmp.ne.s32.totalorder %s17_s10, %s77_s20  ;;  %p83_p5 = scmp.lt.s32.totalorder %s77_s20, %s77_s20 }
   0xd   :  { %p84_p6 = por %p83_p5, %p82_p4 }
   0xf   :  { %p85_p7 = pnand %p84_p6, %p78_p3 }
  0x11   :  { %88 = shalt.err (!%p85_p7)
}
  0x12   :  { %19 = dma.hbm_to_vmem [thread:$0]  %s194_s0, 128, %s17_s10, [#allocation3]  }
  0x13   :  { %s89_s25 = scalar_lea.hbm %s195_s1, 128 }
  0x14   :  { %p90_p8 = scmp.ne.s32.totalorder %s195_s1, %s89_s25  ;;  %p93_p9 = scmp.lt.u32.totalorder %s89_s25, %s195_s1 }
  0x16   :  { %p95_p10 = pnand %p93_p9, %p90_p8 }
  0x18   :  { %98 = shalt.err (!%p95_p10)
}
  0x19   :  { %s99_s30 = scalar_lea.vmem %s27_s12, 128  ;;  %p104_p12 = scmp.lt.s32.totalorder %s27_s12, %s27_s12 }
  0x1a   :  { %p100_p11 = scmp.ne.s32.totalorder %s27_s12, %s99_s30  ;;  %p105_p13 = scmp.lt.s32.totalorder %s99_s30, %s99_s30 }
  0x1c   :  { %p106_p0 = por %p105_p13, %p104_p12 }
  0x1e   :  { %p107_p1 = pnand %p106_p0, %p100_p11 }
  0x20   :  { %110 = shalt.err (!%p107_p1)
}
  0x21   :  { %29 = dma.hbm_to_vmem [thread:$0]  %s195_s1, 128, %s27_s12, [#allocation6]  }
  0x22   :  { %133 = dma.done.wait [#allocation3], 128  }
  0x23   :  { %134 = vsyncadd [#allocation3], 4294967168 }
  0x24   :  { %135 = dma.done.wait [#allocation6], 128  }
  0x25   :  { %136 = vsyncadd [#allocation6], 4294967168  ;;  %v36_v0 = vld [vmem:[#allocation5] sm:$0xff]  ;;  %s141_s4 = smov 32   ;;  %vm41_vm0 = vcmask 261120   ;;  %v43_v1 = vld [vmem:[#allocation2] sm:$0xff] }
  0x26   :  { %38 = vrot.lane.b32.xlu0 %v36_v0, %s141_s4  ;;  %s142_s5 = smov [#allocation7]   ;;  %vm45_vm1 = vcmask 523264  }
  0x27   :  { %s53_s6 = sshll.u32 %s142_s5, 4  ;;  %s54_s6 = int_to_ptr.vmem [resolvable:$true] %s53_s6 }
  0x28   :  { %s111_s7 = scalar_lea.vmem %s54_s6, 128  ;;  %p116_p3 = scmp.lt.s32.totalorder %s54_s6, %s54_s6 }
  0x29   :  { %p112_p2 = scmp.ne.s32.totalorder %s54_s6, %s111_s7  ;;  %p117_p4 = scmp.lt.s32.totalorder %s111_s7, %s111_s7 }
  0x2b   :  { %p118_p5 = por %p117_p4, %p116_p3 }
  0x2d   :  { %p119_p6 = pnand %p118_p5, %p112_p2 }
  0x98   :  { %v39_v2 = vpop.permute.xlu0 %38 }
  0x99   :  { %v42_v3 = vsel %vm41_vm0, %v36_v0, %v39_v2 }
  0x9a   :  { %v44_v4 = vadd.f32 %v43_v1, %v42_v3 }
  0x9c   :  { %46 = vst.msk [vmem:[#allocation7] sm:$0xff] %vm45_vm1, %v44_v4 }
  0x9d   :  { %122 = shalt.err (!%p119_p6)
}
  0x9e   :  { %s123_s9 = scalar_lea.hbm %s196_s2, 128 }
  0x9f   :  { %p124_p7 = scmp.ne.s32.totalorder %s196_s2, %s123_s9  ;;  %p127_p8 = scmp.lt.u32.totalorder %s123_s9, %s196_s2 }
  0xa1   :  { %p129_p9 = pnand %p127_p8, %p124_p7 }
  0xa3   :  { %132 = shalt.err (!%p129_p9)
}
  0xa4   :  { %56 = dma.vmem_to_hbm [thread:$0]  %s54_s6, 128, %s196_s2, [#allocation4]  }
  0xa5   :  { %137 = dma.done.wait [#allocation4], 128  }
  0xa6   :  { %138 = vsyncadd [#allocation4], 4294967168 }
  0xa7   :  { %60 = vsyncpa [#allocation3], 1 }
  0xa8   :  { %61 = vsyncpa [#allocation6], 1 }
  0xa9   :  { %62 = vsyncpa [#allocation4], 1 }

</bundles_post_ra>
